<compile_context>
chip_gen: v7x
topology: tpu7x:2x2x1
jax: 0.10.0
libtpu: 0.0.40
codegen_flags: <defaults>
</compile_context>

<pallas_src>
import functools

import jax
import jax.numpy as jnp
from jax.experimental import pallas as pl
from jax.experimental.pallas import tpu as pltpu


# ----------------------------- Pallas kernel ------------------------------ #

def _layernorm_kernel(x_ref, g_ref, b_ref, o_ref, *, eps):
    """One (1, C, t) tile: normalize over the channel (sublane) axis."""
    x = x_ref[...].astype(jnp.float32)                      # (1, C, t)
    mean = jnp.mean(x, axis=1, keepdims=True)               # (1, 1, t)
    cen = x - mean
    var = jnp.mean(cen * cen, axis=1, keepdims=True)        # unbiased=False
    std = jnp.sqrt(var)
    y = cen / (std + eps)                                   # PyTorch: eps added to std
    o_ref[...] = (y * g_ref[...] + b_ref[...]).astype(o_ref.dtype)


# ------------------------------ JAX wrapper -------------------------------- #

def layernorm_forward(x, g, b, eps=1e-5):
    """x: (N, C, H, W); g, b: broadcastable to (1, C, 1, 1). Returns (N, C, H, W)."""
    N, C, H, W = x.shape
    HW = H * W
    LANE = 128

    # Spatial tile: multiple of 128 (lane-dense), capped by a VMEM budget so
    # 2x double-buffered (in + out) f32 tiles stay well under v7x's 64 MiB.
    max_t_vmem = max(LANE, (6 * 1024 * 1024) // max(1, C * 4))
    max_t_vmem = (max_t_vmem // LANE) * LANE
    hw_lane = pl.cdiv(HW, LANE) * LANE
    t = max(LANE, min(2048, max_t_vmem, hw_lane))
    HW_pad = pl.cdiv(HW, t) * t

    x2 = x.reshape(N, C, HW)
    if HW_pad != HW:
        # Padding only adds extra spatial columns; stats are per-column, so the
        # padded columns never affect real outputs and are sliced off below.
        x2 = jnp.pad(x2, ((0, 0), (0, 0), (0, HW_pad - HW)))

    g3 = jnp.asarray(g, jnp.float32).reshape(1, C, 1)
    b3 = jnp.asarray(b, jnp.float32).reshape(1, C, 1)

    grid = (N, HW_pad // t)

    # VMEM budget: double-buffered input + output tiles, params, f32 temporaries.
    itemsize = jnp.dtype(x.dtype).itemsize
    needed = 2 * 2 * (C * t * itemsize) + 2 * C * 4 + (1 << 20)
    vmem_limit = int(min(64 * 2**20, max(16 * 2**20, 4 * needed)))

    out = pl.pallas_call(
        functools.partial(_layernorm_kernel, eps=float(eps)),
        out_shape=jax.ShapeDtypeStruct((N, C, HW_pad), x.dtype),
        grid_spec=pltpu.PrefetchScalarGridSpec(
            num_scalar_prefetch=0,
            grid=grid,
            in_specs=[
                pl.BlockSpec((1, C, t), lambda n, j: (n, 0, j)),   # x tile
                pl.BlockSpec((1, C, 1), lambda n, j: (0, 0, 0)),   # g (resident)
                pl.BlockSpec((1, C, 1), lambda n, j: (0, 0, 0)),   # b (resident)
            ],
            out_specs=pl.BlockSpec((1, C, t), lambda n, j: (n, 0, j)),
        ),
        compiler_params=pltpu.CompilerParams(
            dimension_semantics=("parallel", "parallel"),
            vmem_limit_bytes=vmem_limit,
        ),
    )(x2, g3, b3)

    return out[:, :, :HW].reshape(N, C, H, W)


# --------------------------------- main ------------------------------------ #

if __name__ == "__main__":
    key = jax.random.PRNGKey(0)
    k_x, k_g, k_b = jax.random.split(key, 3)

    N, C, H, W = 2, 4, 16, 16  # dim = 4
    eps = 1e-5
    x = jax.random.normal(k_x, (N, C, H, W), dtype=jnp.float32)
    # Parameters (module initializes g=1, b=0; use random values for a stricter check).
    g = 1.0 + 0.1 * jax.random.normal(k_g, (1, C, 1, 1), dtype=jnp.float32)
    b = 0.1 * jax.random.normal(k_b, (1, C, 1, 1), dtype=jnp.float32)

    y = layernorm_forward(x, g, b, eps=eps)
    y = jax.block_until_ready(y)

    # Pure-JAX reference matching the PyTorch forward exactly.
    mean = jnp.mean(x, axis=1, keepdims=True)
    var = jnp.mean(jnp.square(x - mean), axis=1, keepdims=True)  # unbiased=False
    y_ref = (x - mean) / (jnp.sqrt(var) + eps) * g + b

    assert y.shape == (N, C, H, W)
    assert jnp.allclose(y, y_ref, atol=1e-5, rtol=1e-5)

    print("KERNEL_OK")
</pallas_src>

<mosaic_0001>
module attributes {stable_mosaic.version = 11 : i64} {
  func.func @_layernorm_kernel(%arg0: i32, %arg1: i32, %arg2: memref<1x4x256xf32, #tpu.memory_space<vmem>>, %arg3: memref<1x4x1xf32, #tpu.memory_space<vmem>>, %arg4: memref<1x4x1xf32, #tpu.memory_space<vmem>>, %arg5: memref<1x4x256xf32, #tpu.memory_space<vmem>>) attributes {dimension_semantics = [#tpu.dimension_semantics<parallel>, #tpu.dimension_semantics<parallel>], iteration_bounds = array<i64: 2, 1>, scalar_prefetch = 0 : i64, scratch_operands = 0 : i64, tpu.core_type = #tpu.core_type<tc>, window_params = [{transform_indices = @transform_0, window_bounds = array<i64: 1, 4, 256>}, {pipeline_mode = #tpu.pipeline_mode<synchronous>, transform_indices = @transform_1, window_bounds = array<i64: 1, 4, 1>}, {pipeline_mode = #tpu.pipeline_mode<synchronous>, transform_indices = @transform_2, window_bounds = array<i64: 1, 4, 1>}, {transform_indices = @transform_3, window_bounds = array<i64: 1, 4, 256>}]} {
    %c0 = arith.constant 0 : index
    %c0_0 = arith.constant 0 : index
    %c0_1 = arith.constant 0 : index
    %0 = vector.load %arg2[%c0, %c0_0, %c0_1] : memref<1x4x256xf32, #tpu.memory_space<vmem>>, vector<1x4x256xf32>
    %cst = arith.constant dense<0.000000e+00> : vector<1x256xf32>
    %1 = vector.multi_reduction <add>, %0, %cst [1] : vector<1x4x256xf32> to vector<1x256xf32>
    %2 = vector.shape_cast %1 : vector<1x256xf32> to vector<1x1x256xf32>
    %cst_2 = arith.constant 4.000000e+00 : f32
    %3 = vector.broadcast %cst_2 : f32 to vector<1x1x256xf32>
    %4 = arith.divf %2, %3 : vector<1x1x256xf32>
    %5 = vector.broadcast %4 : vector<1x1x256xf32> to vector<1x4x256xf32>
    %6 = arith.subf %0, %5 : vector<1x4x256xf32>
    %7 = arith.mulf %6, %6 : vector<1x4x256xf32>
    %cst_3 = arith.constant dense<0.000000e+00> : vector<1x256xf32>
    %8 = vector.multi_reduction <add>, %7, %cst_3 [1] : vector<1x4x256xf32> to vector<1x256xf32>
    %9 = vector.shape_cast %8 : vector<1x256xf32> to vector<1x1x256xf32>
    %cst_4 = arith.constant 4.000000e+00 : f32
    %10 = vector.broadcast %cst_4 : f32 to vector<1x1x256xf32>
    %11 = arith.divf %9, %10 : vector<1x1x256xf32>
    %12 = math.sqrt %11 : vector<1x1x256xf32>
    %cst_5 = arith.constant 9.99999974E-6 : f32
    %13 = vector.broadcast %cst_5 : f32 to vector<1x1x256xf32>
    %14 = arith.addf %12, %13 : vector<1x1x256xf32>
    %15 = vector.broadcast %14 : vector<1x1x256xf32> to vector<1x4x256xf32>
    %16 = arith.divf %6, %15 : vector<1x4x256xf32>
    %c0_6 = arith.constant 0 : index
    %c0_7 = arith.constant 0 : index
    %c0_8 = arith.constant 0 : index
    %17 = vector.load %arg3[%c0_6, %c0_7, %c0_8] : memref<1x4x1xf32, #tpu.memory_space<vmem>>, vector<1x4x1xf32>
    %18 = vector.broadcast %17 : vector<1x4x1xf32> to vector<1x4x256xf32>
    %19 = arith.mulf %16, %18 : vector<1x4x256xf32>
    %c0_9 = arith.constant 0 : index
    %c0_10 = arith.constant 0 : index
    %c0_11 = arith.constant 0 : index
    %20 = vector.load %arg4[%c0_9, %c0_10, %c0_11] : memref<1x4x1xf32, #tpu.memory_space<vmem>>, vector<1x4x1xf32>
    %21 = vector.broadcast %20 : vector<1x4x1xf32> to vector<1x4x256xf32>
    %22 = arith.addf %19, %21 : vector<1x4x256xf32>
    %c0_12 = arith.constant 0 : index
    %c0_13 = arith.constant 0 : index
    %c0_14 = arith.constant 0 : index
    %23 = vector.load %arg5[%c0_12, %c0_13, %c0_14] : memref<1x4x256xf32, #tpu.memory_space<vmem>>, vector<1x4x256xf32>
    tpu.vector_store %arg5[%c0_12, %c0_13, %c0_14], %22 {strides = array<i32>} : memref<1x4x256xf32, #tpu.memory_space<vmem>>, vector<1x4x256xf32>,
    return
  }
  func.func @transform_0(%arg0: i32, %arg1: i32) -> (i32, i32, i32) {
    %c0_i32 = arith.constant 0 : i32
    %c0_i32_0 = arith.constant 0 : i32
    return %arg0, %c0_i32, %arg1 : i32, i32, i32
  }
  func.func @transform_1(%arg0: i32, %arg1: i32) -> (i32, i32, i32) {
    %c0_i32 = arith.constant 0 : i32
    %c0_i32_0 = arith.constant 0 : i32
    %c0_i32_1 = arith.constant 0 : i32
    %c0_i32_2 = arith.constant 0 : i32
    return %c0_i32, %c0_i32_0, %c0_i32_1 : i32, i32, i32
  }
  func.func @transform_2(%arg0: i32, %arg1: i32) -> (i32, i32, i32) {
    %c0_i32 = arith.constant 0 : i32
    %c0_i32_0 = arith.constant 0 : i32
    %c0_i32_1 = arith.constant 0 : i32
    %c0_i32_2 = arith.constant 0 : i32
    return %c0_i32, %c0_i32_0, %c0_i32_1 : i32, i32, i32
  }
  func.func @transform_3(%arg0: i32, %arg1: i32) -> (i32, i32, i32) {
    %c0_i32 = arith.constant 0 : i32
    %c0_i32_0 = arith.constant 0 : i32
    return %arg0, %c0_i32, %arg1 : i32, i32, i32
  }
}

</mosaic_0001>

<bundles_post_ra>
// kernel: tpu_custom_call.1
= control target key start
LH: loop header
LB: loop body
LE: loop exit
PB: predicated region body
PF: predicated region fallthrough
CT: control target
= control target key end

     0   :  { %8 = vsyncpa [#allocation3], 0  ;;  %s819_s0 = inlined_call_operand.hbm [shape: f32[2,4,256], index: 0, kind: input, shape index: {}]   ;;  %s820_s1 = inlined_call_operand.vmem [shape: f32[1,4,1], index: 1, kind: input, shape index: {}]   ;;  %s821_s2 = inlined_call_operand.vmem [shape: f32[1,4,1], index: 2, kind: input, shape index: {}]   ;;  %s822_s3 = inlined_call_operand.hbm [shape: f32[2,4,256], index: 3, kind: output, shape index: {}]  }
   0x1   :  { %10 = vsyncpa [#allocation3 + $0x1], 0 }
   0x2   :  { %11 = vsyncpa [#allocation4], 0 }
   0x3   :  { %13 = vsyncpa [#allocation4 + $0x1], 0  ;;  %s633_s12 = smov 0   ;;  %s635_s13 = smov 0  }
   0x4   :  { %s637_s14 = smov 0   ;;  %s639_s15 = smov 0  }
   0x5   :  { %s641_s16 = smov 0   ;;  %s643_s17 = smov 0  }
   0x6 LB: > { %s406_s18 = sadd.s32 4294967295, %s607_s17   ;;  %s407_s19 = sadd.s32 4294967294, %s607_s17   ;;  %s607_s17 = sphi %s643_s17, %s19_s17   ;;  %s603_s16 = sphi %s641_s16, %s838_s16   ;;  %s599_s15 = sphi %s639_s15, %s837_s15   ;;  %s595_s14 = sphi %s637_s14, %s836_s14   ;;  %s591_s13 = sphi %s635_s13, %s835_s13   ;;  %s587_s12 = sphi %s633_s12, %s834_s12  }
   0x7   : > { %s31_s20 = sadd.s32 1, %s603_s16  ;;  %s40_s21 = sadd.s32 1, %s595_s14 }
   0x8   : > { %p33_p0 = scmp.ge.s32.totalorder %s31_s20, 2  ;;  %p47_p1 = scmp.ne.s32.totalorder %s595_s14, %s591_s13 }
   0x9   : > { %p48_p2 = scmp.eq.s32.totalorder %s607_s17, 0  ;;  %p53_p3 = scmp.ne.s32.totalorder %s591_s13, %s587_s12 }
   0xa   : > { %s840_s20 = smov (%p33_p0, %s31_s20), 0  ;;  %p54_p5 = scmp.eq.s32.totalorder %s406_s18, 0 }
   0xb   : > { %p674_p4 = por %p48_p2, %p47_p1  ;;  %s35_s23 = ssub.s32 %s603_s16, %s840_s20 }
   0xc   : > { %p121_p6 = scmp.eq.s32.totalorder %s406_s18, 1  ;;  %p38_p7 = scmp.eq.s32.totalorder %s35_s23, 0 }
   0xd   : > { %p680_p8 = por %p54_p5, %p53_p3  ;;  %p127_p10 = scmp.eq.s32.totalorder %s407_s19, 1 }
   0xe   : > { %p684_p9 = por %p121_p6, %p47_p1  ;;  %p435_p13 = scmp.lt.s32.totalorder %s607_s17, 2 }
   0xf   : > { %s689_s26 = scalar_select %p38_p7, %s595_s14, %s40_s21  }
  0x10   : > { %s826_s25 = scalar_select %p684_p9, 1, 0 }
  0x11   : > { %p691_p11 = por %p127_p10, %p53_p3  ;;  %s153_s28 = sand.u32 1, %s595_s14  }
  0x12   : > { %s410_s29 = sshll.u32 %s153_s28, 3  ;;  %s421_s30 = sshll.u32 %s603_s16, 7 }
  0x13   : > { %s827_s27 = scalar_select %p691_p11, 1, 0 }
  0x14   : > { %s702_s6 = scalar_lea.hbm %s819_s0, %s421_s30  ;;  %s157_s7 = scalar_lea.vmem [#allocation2], %s410_s29 }
  0x15   : > { %s167_s8 = sshll.u32 %s157_s7, 4  ;;  %p708_p0 = pnand %p435_p13, %p674_p4  ;;  %s704_s8 = int_to_ptr.vmem [resolvable:$true] %s167_s8 }
  0x16   : > { %s154_s10 = scalar_lea.sflag [#allocation3], %s153_s28  ;;  %s495_s11 = scalar_lea.hbm %s702_s6, 128 }
  0x17   : > { %p496_p3 = scmp.ne.s32.totalorder %s702_s6, %s495_s11  ;;  %p497_p5 = pneg %p708_p0 }
  0x18   : > { %s500_s21 = scalar_lea.hbm %s819_s0, 256  ;;  %p501_p4 = scmp.lt.u32.totalorder %s702_s6, %s819_s0 }
  0x19   : > { %p498_p6 = pnand %p497_p5, %p496_p3  ;;  %p502_p10 = scmp.lt.u32.totalorder %s500_s21, %s495_s11 }
  0x1a   : > { %p504_p12 = scmp.lt.u32.totalorder %s495_s11, %s702_s6 }
  0x1b   : > { %p499_p7 = pneg %p498_p6  ;;  %p503_p13 = por %p502_p10, %p501_p4 }
  0x1d   : > { %p505_p1 = por %p504_p12, %p503_p13 }
  0x1f   : > { %p506_p2 = pnand %p505_p1, %p499_p7 }
  0x21   : > { %509 = shalt.err (!%p506_p2)
}
  0x22   : > { %s510_s28 = scalar_lea.vmem %s704_s8, 128  ;;  %s609_s29 = smov [#allocation2]  }
  0x23   : > { %p511_p3 = scmp.ne.s32.totalorder %s704_s8, %s510_s28  ;;  %s515_s30 = sshll.u32 %s609_s29, 4  ;;  %s516_s30 = int_to_ptr.vmem [resolvable:$false] %s515_s30 }
  0x24   : > { %s517_s4 = scalar_lea.vmem %s516_s30, 256  ;;  %p518_p9 = scmp.lt.s32.totalorder %s704_s8, %s516_s30 }
  0x25   : > { %p513_p6 = pnand %p511_p3, %p497_p5  ;;  %p519_p4 = scmp.lt.s32.totalorder %s517_s4, %s510_s28 }
  0x27   : > { %p514_p11 = pneg %p513_p6  ;;  %p520_p10 = por %p519_p4, %p518_p9 }
  0x29   : > { %p521_p12 = pnand %p520_p10, %p514_p11 }
  0x2b   : > { %524 = shalt.err (!%p521_p12)
}
  0x2c   : > { %430 = dma.hbm_to_vmem [thread:$0]  (!%p708_p0), %s702_s6, 128, %s704_s8, %s154_s10  }
  0x2d   : > { %p829_p1 = scmp.lt.s32.totalorder %s607_s17, 3  ;;  %p830_p2 = scmp.ge.s32.totalorder %s607_s17, 1 }
  0x2f   : > { %p173_p5 = pnand %p830_p2, %p829_p1 }
  0x30   : > { %s744_s5 = sand.u32 (!%p173_p5), 1, %s591_s13  }
  0x31   : > { %176 = sbr.rel (%p173_p5) target bundleno = 209 (0xd1), region = 32  ;;  %s414_s7 = sshll.u32 (!%p173_p5), %s744_s5, 3 }
  0x32   : > { %s179_s11 = scalar_lea.sflag (!%p173_p5), [#allocation3], %s744_s5  ;;  %s182_s9 = scalar_lea.vmem (!%p173_p5), [#allocation2], %s414_s7 }
  0x38   : > { %578 = dma.done.wait (%p680_p8), %s179_s11, 128  }
  0x39   : > { %580 = vsyncadd (%p680_p8), %s179_s11, 4294967168  ;;  %v610_v0 = vmov 0   ;;  %v276_v1 = vld [vmem:[%s820_s1] sm:$0xf]  ;;  %vm211_vm0 = vcmask 1043456   ;;  %v284_v56 = vlaneseq  ;;  %s422_s24 = sshll.u32 %s599_s15, 7 }
  0x3a   : > { %487 = vset.pattern.permute.xlu0 %v610_v0  ;;  %v207_v2 = vld [vmem:[%s182_s9] sm:$0xff]  ;;  %v611_v54 = vmov 839922192   ;;  %s204_s19 = scalar_lea.vmem [#allocation5], %s414_s7  ;;  %s770_s28 = scalar_lea.hbm %s822_s3, %s422_s24 }
  0x3b   : > { %279 = vperm.xlu0 %487, %v276_v1   ;;  %v290_v3 = vld [vmem:[%s821_s2] sm:$0xf]  ;;  %v209_v4 = vcombine.high %v207_v2, %v207_v2  ;;  %v212_v5 = vsel %vm211_vm0, %v207_v2, 0.0  ;;  %v282_v55 = vunpack.c.l.s4 %v611_v54  ;;  %v285_v58 = vshrl.u32 %v284_v56, 7  ;;  %s322_s21 = sshll.u32 %s204_s19, 4  ;;  %s306_s29 = scalar_lea.sflag [#allocation4], %s744_s5  ;;  %s772_s21 = int_to_ptr.vmem [resolvable:$true] %s322_s21 }
  0x3c   : > { %v213_v7 = vrot.slane %v212_v5, 4  ;;  %s525_s30 = scalar_lea.vmem %s772_s21, 128  ;;  %p831_p9 = scmp.ne.s32.totalorder %s826_s25, 0 }
  0x3d   : > { %v219_v6 = vsel %vm211_vm0, %v209_v4, 0.0  ;;  %v283_v57 = vunpack.c.0.s8 %v282_v55  ;;  %p526_p8 = scmp.ne.s32.totalorder %s772_s21, %s525_s30  ;;  %s612_s15 = smov [#allocation5]  }
  0x3e   : > { %v220_v8 = vrot.slane %v219_v6, 4  ;;  %v214_v9 = vadd.f32 %v213_v7, %v212_v5  ;;  %s529_s4 = sshll.u32 %s612_s15, 4  ;;  %s530_s4 = int_to_ptr.vmem [resolvable:$false] %s529_s4 }
  0x3f   : > { %293 = vperm.xlu0 %487, %v290_v3   ;;  %v286_v59 = vsub.s32 %v283_v57, %v285_v58  ;;  %p527_p11 = pnand %p526_p8, %p831_p9  ;;  %s531_s7 = scalar_lea.vmem %s530_s4, 256 }
  0x40   : > { %v221_v10 = vadd.f32 %v220_v8, %v219_v6  ;;  %v215_v11 = vrot.slane %v214_v9, 2  ;;  %p532_p7 = scmp.lt.s32.totalorder %s772_s21, %s530_s4  ;;  %p533_p13 = scmp.lt.s32.totalorder %s531_s7, %s525_s30 }
  0x41   : > { %p528_p0 = pneg %p527_p11 }
  0x42   : > { %v222_v12 = vrot.slane %v221_v10, 2  ;;  %v216_v13 = vadd.f32 %v215_v11, %v214_v9  ;;  %p534_p3 = por %p533_p13, %p532_p7 }
  0x44   : > { %v223_v14 = vadd.f32 %v222_v12, %v221_v10  ;;  %v217_v15 = vrot.slane %v216_v13, 1  ;;  %p535_p6 = pnand %p534_p3, %p528_p0 }
  0x46   : > { %v224_v16 = vrot.slane %v223_v14, 1  ;;  %v218_v17 = vadd.f32 %v217_v15, %v216_v13 }
  0x48   : > { %v225_v18 = vadd.f32 %v224_v16, %v223_v14  ;;  %v227_v19 = vmul.f32 0.25, %v218_v17 }
  0x4a   : > { %v228_v20 = vmul.f32 0.25, %v225_v18 }
  0x4c   : > { %v231_v21 = vcombine.low %v227_v19, %v228_v20 }
  0x4e   : > { %v233_v22 = vsub.f32 %v207_v2, %v231_v21 }
  0x50   : > { %v234_v23 = vmul.f32 %v233_v22, %v233_v22 }
  0x52   : > { %v236_v24 = vcombine.high %v234_v23, %v234_v23  ;;  %v238_v25 = vsel %vm211_vm0, %v234_v23, 0.0 }
  0x53   : > { %v239_v27 = vrot.slane %v238_v25, 4 }
  0x54   : > { %v245_v26 = vsel %vm211_vm0, %v236_v24, 0.0 }
  0x55   : > { %v246_v28 = vrot.slane %v245_v26, 4  ;;  %v240_v29 = vadd.f32 %v239_v27, %v238_v25 }
  0x57   : > { %v247_v30 = vadd.f32 %v246_v28, %v245_v26  ;;  %v241_v31 = vrot.slane %v240_v29, 2 }
  0x59   : > { %v248_v32 = vrot.slane %v247_v30, 2  ;;  %v242_v33 = vadd.f32 %v241_v31, %v240_v29 }
  0x5b   : > { %v249_v34 = vadd.f32 %v248_v32, %v247_v30  ;;  %v243_v35 = vrot.slane %v242_v33, 1 }
  0x5d   : > { %v250_v36 = vrot.slane %v249_v34, 1  ;;  %v244_v37 = vadd.f32 %v243_v35, %v242_v33 }
  0x5f   : > { %v251_v38 = vadd.f32 %v250_v36, %v249_v34  ;;  %v252_v39 = vmul.f32 0.25, %v244_v37 }
  0x61   : > { %v253_v40 = vmul.f32 0.25, %v251_v38  ;;  %489 = vrsqrt.f32 %v252_v39  ;;  %vm256_vm1 = vcmp.eq.f32.partialorder %v252_v39, inf  ;;  %v259_v45 = vand.u32 2147483648, %v252_v39 }
  0x62   : > { %vm258_vm3 = vcmp.eq.f32.partialorder %v252_v39, 0.0 }
  0x63   : > { %491 = vrsqrt.f32 %v253_v40  ;;  %vm263_vm2 = vcmp.eq.f32.partialorder %v253_v40, inf  ;;  %v266_v46 = vand.u32 2147483648, %v253_v40  ;;  %vm265_vm4 = vcmp.eq.f32.partialorder %v253_v40, 0.0 }
  0x6b   : > { %v490_v41 = vpop.eup %489 }
  0x6c   : > { %v255_v43 = vmul.f32 %v490_v41, %v252_v39 }
  0x6d   : > { %v492_v42 = vpop.eup %491 }
  0x6e   : > { %v262_v44 = vmul.f32 %v492_v42, %v253_v40  ;;  %v257_v47 = vsel %vm256_vm1, %v252_v39, %v255_v43 }
  0x6f   : > { %v260_v49 = vsel %vm258_vm3, %v259_v45, %v257_v47 }
  0x70   : > { %v264_v48 = vsel %vm263_vm2, %v253_v40, %v262_v44  ;;  %v268_v51 = vadd.f32 1e-05, %v260_v49 }
  0x71   : > { %v267_v50 = vsel %vm265_vm4, %v266_v46, %v264_v48 }
  0x72   : > { %v269_v52 = vadd.f32 1e-05, %v267_v50 }
  0x74   : > { %v272_v53 = vcombine.low %v268_v51, %v269_v52 }
  0x76   : > { %493 = vrcp.f32 %v272_v53 }
  0x80   : > { %v494_v60 = vpop.eup %493 }
  0x81   : > { %v275_v62 = vmul.f32 %v494_v60, %v233_v22 }
  0xba   : > { %v280_v61 = vpop.permute.xlu0 %279 }
  0xbb   : > { %v287_v63 = vrot.slane %v280_v61, %v286_v59 }
  0xbd   : > { %v289_v1 = vmul.f32 %v287_v63, %v275_v62 }
  0xbe   : > { %v294_v0 = vpop.permute.xlu0 %293 }
  0xbf   : > { %v301_v2 = vrot.slane %v294_v0, %v286_v59 }
  0xc1   : > { %v303_v3 = vadd.f32 %v301_v2, %v289_v1 }
  0xc3   : > { %304 = vst [vmem:[%s204_s19] sm:$0xff] %v303_v3 }
  0xc4   : > { %538 = shalt.err (!%p535_p6)
}
  0xc5   : > { %s539_s5 = scalar_lea.hbm %s770_s28, 128  ;;  %s543_s6 = scalar_lea.hbm %s822_s3, 256 }
  0xc6   : > { %p540_p4 = scmp.ne.s32.totalorder %s770_s28, %s539_s5  ;;  %p544_p1 = scmp.lt.u32.totalorder %s770_s28, %s822_s3 }
  0xc7   : > { %p545_p2 = scmp.lt.u32.totalorder %s543_s6, %s539_s5  ;;  %p547_p8 = scmp.lt.u32.totalorder %s539_s5, %s770_s28 }
  0xc8   : > { %p541_p10 = pnand %p540_p4, %p831_p9 }
  0xc9   : > { %p546_p5 = por %p545_p2, %p544_p1 }
  0xca   : > { %p542_p12 = pneg %p541_p10 }
  0xcb   : > { %p548_p11 = por %p547_p8, %p546_p5 }
  0xcd   : > { %p549_p0 = pnand %p548_p11, %p542_p12 }
  0xcf   : > { %552 = shalt.err (!%p549_p0)
}
  0xd0   : > { %425 = dma.vmem_to_hbm [thread:$0]  (%p831_p9), %s772_s21, 128, %s770_s28, %s306_s29  }
  0xd1 PF: > { %s334_s18 = sand.u32 1, %s587_s12   ;;  %p832_p7 = scmp.ne.s32.totalorder %s827_s27, 0 }
  0xd2   : > { %p833_p13 = scmp.ge.s32.totalorder %s607_s17, 2  ;;  %s335_s24 = scalar_lea.sflag [#allocation4], %s334_s18 }
  0xd4   : > { %p432_p3 = pnand %p833_p13, %p832_p7 }
  0xd6   : > { %582 = dma.done.wait (!%p432_p3), %s335_s24, 128  }
  0xd7   : > { %584 = vsyncadd (!%p432_p3), %s335_s24, 4294967168  ;;  %s19_s17 = sadd.s32 1, %s607_s17   ;;  %s834_s12 = smov %s591_s13 }
  0xd8   : > { %p16_p6 = scmp.ge.s32.totalorder %s19_s17, 4   ;;  %s835_s13 = smov %s595_s14 }
  0xd9   : > { %s836_s14 = smov %s689_s26  ;;  %s837_s15 = smov %s603_s16 }
  0xda   : > { %s838_s16 = smov %s840_s20  ;;  %18 = sbr.rel (!%p16_p6) target bundleno = 6 (0x6), region = 77 }
  0xe1   :  { %340 = vsyncpa [#allocation3], 1 }
  0xe2   :  { %342 = vsyncpa [#allocation3 + $0x1], 1 }
  0xe3   :  { %343 = vsyncpa [#allocation4], 1 }
  0xe4   :  { %345 = vsyncpa [#allocation4 + $0x1], 1 }

</bundles_post_ra>
